<compile_context>
chip_gen: v7x
topology: tpu7x:2x2x1
jax: 0.10.0
libtpu: 0.0.40
codegen_flags: <defaults>
</compile_context>

<pallas_src>
import jax
import jax.numpy as jnp
from jax.experimental import pallas as pl
from jax.experimental.pallas import tpu as pltpu


# Arrays larger than this are split into multiple concurrent DMA chunks along axis 0.
_CHUNK_THRESHOLD_BYTES = 8 * 1024 * 1024
_MAX_CHUNKS = 4


def _make_hbm_copy_kernel(chunks):
    """Build a kernel that DMAs `chunks` (static (start, size) pairs along axis 0)
    directly from the HBM input ref to the HBM output ref. No VMEM is touched."""

    def kernel(x_hbm, o_hbm, sems):
        copies = []
        # Start every chunk's DMA first so the DMA engine(s) can overlap them ...
        for i, (start, size) in enumerate(chunks):
            cp = pltpu.make_async_copy(
                x_hbm.at[pl.ds(start, size)],
                o_hbm.at[pl.ds(start, size)],
                sems.at[i],
            )
            cp.start()
            copies.append(cp)
        # ... then wait for all of them.
        for cp in copies:
            cp.wait()

    return kernel


def _hbm_to_hbm_copy(x):
    nbytes = x.size * x.dtype.itemsize
    lead = x.shape[0]

    if nbytes > _CHUNK_THRESHOLD_BYTES and lead >= 2:
        n_chunks = min(_MAX_CHUNKS, lead)
    else:
        n_chunks = 1

    base, rem = divmod(lead, n_chunks)
    chunks = []
    start = 0
    for i in range(n_chunks):
        size = base + (1 if i < rem else 0)
        chunks.append((start, size))
        start += size

    return pl.pallas_call(
        _make_hbm_copy_kernel(chunks),
        out_shape=jax.ShapeDtypeStruct(x.shape, x.dtype),
        in_specs=[pl.BlockSpec(memory_space=pl.ANY)],   # raw HBM ref, no auto-DMA
        out_specs=pl.BlockSpec(memory_space=pl.ANY),    # raw HBM ref, no auto-DMA
        scratch_shapes=[pltpu.SemaphoreType.DMA((len(chunks),))],
        cost_estimate=pl.CostEstimate(
            flops=0, transcendentals=0, bytes_accessed=2 * nbytes),
    )(x)


def print_layer(x):
    """JAX/Pallas equivalent of PrintLayer.forward: prints x.shape, returns x."""
    # Shapes are static in JAX, so a host-side print mirrors `print(x.shape)`.
    # (Fires once per trace under jax.jit; use jax.debug.print for per-call prints.)
    print(tuple(x.shape))

    if x.size == 0:
        # Nothing to move for an empty tensor.
        return x

    orig_shape = x.shape
    if x.ndim == 0:
        x = x.reshape(1)  # give the DMA a leading axis; metadata-only

    y = _hbm_to_hbm_copy(x)
    return y.reshape(orig_shape)


if __name__ == "__main__":
    key = jax.random.PRNGKey(0)
    # Small NCHW-style input consistent with a conv pipeline's intermediate tensor.
    x = jax.random.normal(key, (2, 4, 16, 16), dtype=jnp.float32)

    y = print_layer(x)
    y = jax.block_until_ready(y)

    assert y.shape == x.shape
    assert y.dtype == x.dtype
    assert bool(jnp.all(y == x))
    print("KERNEL_OK")
</pallas_src>

<mosaic_0001>
module attributes {stable_mosaic.version = 11 : i64} {
  func.func @kernel(%arg0: memref<2x4x16x16xf32, #tpu.memory_space<any>>, %arg1: memref<2x4x16x16xf32, #tpu.memory_space<any>>, %arg2: memref<1x!tpu.dma_semaphore, #tpu.memory_space<semaphore_mem>>) attributes {dimension_semantics = [], scalar_prefetch = 0 : i64, scratch_operands = 1 : i64, tpu.core_type = #tpu.core_type<tc>} {
    %c0_i32 = arith.constant 0 : i32
    %c0_i32_0 = arith.constant 0 : i32
    %c0_i32_1 = arith.constant 0 : i32
    %c0_i32_2 = arith.constant 0 : i32
    %c0_i32_3 = arith.constant 0 : i32
    %0 = tpu.memref_slice %arg0[%c0_i32_0, %c0_i32_1, %c0_i32_2, %c0_i32_3] : memref<2x4x16x16xf32, #tpu.memory_space<any>> -> memref<2x4x16x16xf32, #tpu.memory_space<any>>
    %c0_i32_4 = arith.constant 0 : i32
    %c0_i32_5 = arith.constant 0 : i32
    %c0_i32_6 = arith.constant 0 : i32
    %c0_i32_7 = arith.constant 0 : i32
    %1 = tpu.memref_slice %arg1[%c0_i32_4, %c0_i32_5, %c0_i32_6, %c0_i32_7] : memref<2x4x16x16xf32, #tpu.memory_space<any>> -> memref<2x4x16x16xf32, #tpu.memory_space<any>>
    %2 = tpu.memref_slice %arg2[%c0_i32] : memref<1x!tpu.dma_semaphore, #tpu.memory_space<semaphore_mem>> -> memref<1x!tpu.dma_semaphore, #tpu.memory_space<semaphore_mem>>
    %3 = tpu.memref_squeeze %2 : memref<1x!tpu.dma_semaphore, #tpu.memory_space<semaphore_mem>> -> memref<!tpu.dma_semaphore, #tpu.memory_space<semaphore_mem>>
    tpu.enqueue_dma source(%0 : memref<2x4x16x16xf32, #tpu.memory_space<any>>) target(%1 : memref<2x4x16x16xf32, #tpu.memory_space<any>>) target_semaphore(%3 : memref<!tpu.dma_semaphore, #tpu.memory_space<semaphore_mem>>)
    %c0_i32_8 = arith.constant 0 : i32
    %c0_i32_9 = arith.constant 0 : i32
    %c0_i32_10 = arith.constant 0 : i32
    %c0_i32_11 = arith.constant 0 : i32
    %c0_i32_12 = arith.constant 0 : i32
    %4 = tpu.memref_slice %arg0[%c0_i32_9, %c0_i32_10, %c0_i32_11, %c0_i32_12] : memref<2x4x16x16xf32, #tpu.memory_space<any>> -> memref<2x4x16x16xf32, #tpu.memory_space<any>>
    %c0_i32_13 = arith.constant 0 : i32
    %c0_i32_14 = arith.constant 0 : i32
    %c0_i32_15 = arith.constant 0 : i32
    %c0_i32_16 = arith.constant 0 : i32
    %5 = tpu.memref_slice %arg1[%c0_i32_13, %c0_i32_14, %c0_i32_15, %c0_i32_16] : memref<2x4x16x16xf32, #tpu.memory_space<any>> -> memref<2x4x16x16xf32, #tpu.memory_space<any>>
    %6 = tpu.memref_slice %arg2[%c0_i32_8] : memref<1x!tpu.dma_semaphore, #tpu.memory_space<semaphore_mem>> -> memref<1x!tpu.dma_semaphore, #tpu.memory_space<semaphore_mem>>
    %7 = tpu.memref_squeeze %6 : memref<1x!tpu.dma_semaphore, #tpu.memory_space<semaphore_mem>> -> memref<!tpu.dma_semaphore, #tpu.memory_space<semaphore_mem>>
    tpu.wait_dma2 semaphore(%7 : memref<!tpu.dma_semaphore, #tpu.memory_space<semaphore_mem>>) src(%4 : memref<2x4x16x16xf32, #tpu.memory_space<any>>) dst(%5 : memref<2x4x16x16xf32, #tpu.memory_space<any>>)
    return
  }
}

</mosaic_0001>

<bundles_post_ra>
// kernel: tpu_custom_call.1
= control target key start
LH: loop header
LB: loop body
LE: loop exit
PB: predicated region body
PF: predicated region fallthrough
CT: control target
= control target key end

     0   :  { %s36_s6 = smov [#allocation2]   ;;  %s37_s7 = smov [#allocation3]   ;;  %s55_s0 = inlined_call_operand.hbm [shape: f32[2,4,16,16], index: 0, kind: input, shape index: {}]   ;;  %s56_s1 = inlined_call_operand.hbm [shape: f32[2,4,16,16], index: 1, kind: output, shape index: {}]  }
   0x1   :  { %s38_s8 = smov 0  }
   0x2   :  { %18 = dma.general %s55_s0, 2048, %s56_s1, %s36_s6, %s37_s7, [#allocation4], %s38_s8, 0  }
   0x3   :  { %34 = dma.done.wait [#allocation2], 2048 }
   0x4   :  { %35 = vsyncadd [#allocation2], 4294965248 }
   0x5   :  { %24 = vsyncmov [#allocation2] }
   0x8   :  { %s25_s13 = vpop.sfrf %24 }
   0x9   :  { %p30_p0 = scmp.ne.s32.totalorder %s25_s13, 0 }
   0xb   :  { %29 = shalt.err (%p30_p0)  }

</bundles_post_ra>
